<compile_context>
chip_gen: v7x
topology: tpu7x:2x2x1
jax: 0.10.0
libtpu: 0.0.40
codegen_flags: <defaults>
</compile_context>

<pallas_src>
import math
from functools import partial

import jax
import jax.numpy as jnp
from jax.experimental import pallas as pl
from jax.experimental.pallas import tpu as pltpu

NEG_SLOPE = 0.2                                    # DGL GATConv default negative_slope
MASK_VAL = float(jnp.finfo(jnp.float32).min)       # dtype-aware "minus infinity"


# --------------------------------------------------------------------------
# Kernel 1: per row tile -> acc0 (xse linear), feat_fold (bf16), el/er logits
# --------------------------------------------------------------------------
def prep_kernel(x_ref, gate_ref, w_comb_ref, lin_w_gat_ref, lin_w_x_ref, lin_b_ref,
                acc0_ref, featf_ref, elr_ref, *, num_heads, head_dim, hd):
    # SE scaling (gate broadcast over rows), then bf16 for the MXU.
    xse = (x_ref[...] * gate_ref[...]).astype(jnp.bfloat16)          # (T, F_pad)

    # Single lane-dense K=F MXU pass: columns [0:HD] = feat, [HD:HD+2H] = el/er.
    comb = jnp.dot(xse, w_comb_ref[...], preferred_element_type=jnp.float32)
    elr_ref[...] = comb[:, hd:hd + 2 * num_heads]                     # (T, 2H)

    # xse branch of the final linear (+ folded GAT/linear biases).
    acc0_ref[...] = (jnp.dot(xse, lin_w_x_ref[...],
                             preferred_element_type=jnp.float32)
                     + lin_b_ref[...])                                # (T, NC_pad)

    # Fold the GAT output projection into the per-head feature (lane-dense NC_pad).
    feat = comb[:, :hd].astype(jnp.bfloat16)                          # (T, HD)
    for h in range(num_heads):
        fh = feat[:, h * head_dim:(h + 1) * head_dim]                 # (T, D)
        featf_ref[h] = jnp.dot(fh, lin_w_gat_ref[h],
                               preferred_element_type=jnp.float32
                               ).astype(jnp.bfloat16)                 # (T, NC_pad)


# --------------------------------------------------------------------------
# Kernel 2: per destination-row tile -> masked attention + accumulate into acc0
# --------------------------------------------------------------------------
def gat_kernel(mask_ref, elr_ref, acc0_ref, el_t_ref, featf_ref, out_ref, *, num_heads):
    H = num_heads
    neighbor = mask_ref[...] > 0                    # (T, N_pad) int8 -> bool
    er = elr_ref[...][:, H:]                        # (T, H)
    el_all = el_t_ref[...]                          # (H, N_pad)
    acc = acc0_ref[...]                             # (T, NC_pad) xse-linear partial

    for h in range(H):
        # logits e[i, j] = leaky_relu(er[i] + el[j]); then mask with where().
        e = er[:, h:h + 1] + el_all[h:h + 1, :]     # (T, N_pad)
        e = jnp.where(e >= 0.0, e, NEG_SLOPE * e)
        e = jnp.where(neighbor, e, MASK_VAL)
        m = jnp.max(e, axis=1, keepdims=True)
        p = jnp.exp(e - m)                          # masked entries underflow to 0
        denom = jnp.sum(p, axis=1, keepdims=True)
        # NOTE: rows with no neighbours (only padded rows here; real rows always
        # have a self-loop) give a uniform average instead of NaN - sliced off.

        # Un-normalized aggregation against the projection-folded feature
        # (128-lane-dense MXU), then scale rows with an approx EUP reciprocal.
        agg = jnp.dot(p.astype(jnp.bfloat16), featf_ref[h],
                      preferred_element_type=jnp.float32)             # (T, NC_pad)
        acc = acc + agg * pl.reciprocal(denom, approx=True)

    out_ref[...] = acc.astype(out_ref.dtype)


# --------------------------------------------------------------------------
# Wrapper
# --------------------------------------------------------------------------
def _round_up(x, m):
    return (x + m - 1) // m * m


def _pad2(a, r, c):
    return jnp.pad(a, ((0, r - a.shape[0]), (0, c - a.shape[1])))


def _bytes(shape, itemsize, copies=1):
    return math.prod(shape) * itemsize * copies


def _vmem_capacity_bytes():
    try:
        return int(pltpu.get_tpu_info().vmem_capacity_bytes)
    except Exception:
        return 64 * 1024 * 1024      # conservative: v7x per-TensorCore VMEM


def _mosaic_params(est_bytes, ceiling):
    limit = int(min(max(int(1.25 * est_bytes), 32 * 1024 * 1024), ceiling))
    return pltpu.CompilerParams(dimension_semantics=("parallel",),
                                vmem_limit_bytes=limit)


def deephotresi_forward(x_bLF, adj, params, *, num_heads, head_dim, tile_rows=None):
    B, L, F = x_bLF.shape
    N = B * L
    H, D = num_heads, head_dim
    HD = H * D
    x = x_bLF.astype(jnp.float32).reshape(N, F)          # x.view([B*L, F])
    nclass = params["lin_w"].shape[1]

    # ---- SELayer gate: global column mean + tiny MLP (hoisted, O(F^2/16)) ----
    y = jnp.mean(x, axis=0, keepdims=True)
    h1 = jnp.maximum(y @ params["se_w1"] + params["se_b1"], 0.0)
    gate = jax.nn.sigmoid(h1 @ params["se_w2"] + params["se_b2"])     # (1, F)

    # ---- padded dims ----
    F_pad = _round_up(F, 128)
    NC_pad = _round_up(nclass, 128)
    COMB_pad = _round_up(HD + 2 * H, 128)

    # ---- generation-aware VMEM budget + row tile ----
    cap = _vmem_capacity_bytes()
    ceiling = int(0.85 * cap)                            # headroom for internal scratch
    if tile_rows is None:
        tile_rows = 256 if cap >= 100 * 1024 * 1024 else 128

    def est2_fn(tile, n_pad):
        return (_bytes((tile, n_pad), 1, 2)              # int8 mask stream (dbl-buf)
                + _bytes((tile, 128), 4, 2)              # elr stream
                + _bytes((tile, NC_pad), 4, 4)           # acc0 stream + out
                + _bytes((H, n_pad), 4, 2)               # el_t resident
                + _bytes((H, n_pad, NC_pad), 2, 2)       # feat_fold resident (bf16)
                + _bytes((tile, n_pad), 4, 4))           # e / p f32 temporaries

    # >=2 tiles (so the "parallel" axis splits across TensorCores), 32-row aligned.
    TILE = max(32, min(_round_up(tile_rows, 32), _round_up(-(-N // 2), 32)))
    while TILE > 32 and est2_fn(TILE, _round_up(N, TILE)) > ceiling:
        TILE = max(32, _round_up(TILE // 2, 32))
    N_pad = _round_up(N, TILE)
    grid = (N_pad // TILE,)

    # ---- host-side weight prep ----
    x_p = _pad2(x, N_pad, F_pad)
    gate_p = _pad2(gate, 1, F_pad)

    # el = (xse @ gat_w) @ attn_l == xse @ (gat_w @ attn_l): fold, then merge the
    # 2H el/er columns onto gat_w so kernel 1 does a single lane-dense matmul.
    w_el = params["gat_w"] @ params["attn_l_bd"]                      # (F, H)
    w_er = params["gat_w"] @ params["attn_r_bd"]                      # (F, H)
    w_comb = jnp.concatenate([params["gat_w"], w_el, w_er], axis=1)   # (F, HD+2H)
    w_comb_p = _pad2(w_comb, F_pad, COMB_pad).astype(jnp.bfloat16)

    # Split final linear; fold the GAT output bias into the linear bias.
    lin_w = params["lin_w"]
    lin_w_gat = lin_w[:HD]                                            # (HD, nclass)
    lin_w_x = lin_w[HD:]                                              # (F, nclass)
    lin_b_eff = params["lin_b"] + params["gat_b"] @ lin_w_gat         # (1, nclass)
    lin_w_gat_p = _pad2(lin_w_gat, HD, NC_pad).reshape(H, D, NC_pad).astype(jnp.bfloat16)
    lin_w_x_p = _pad2(lin_w_x, F_pad, NC_pad).astype(jnp.bfloat16)
    lin_b_p = _pad2(lin_b_eff, 1, NC_pad)

    # int8 {0,1} neighbour mask (1 B/elem HBM stream); padded rows/cols masked out.
    mask = adj if adj.dtype == jnp.int8 else (adj != 0).astype(jnp.int8)
    if mask.shape != (N_pad, N_pad):
        mask = _pad2(mask, N_pad, N_pad)

    # ---------------- kernel 1: prep ----------------
    est1 = (_bytes((TILE, F_pad), 4, 2)            # x stream
            + _bytes((TILE, NC_pad), 4, 2)         # acc0 out
            + _bytes((H, TILE, NC_pad), 2, 2)      # feat_fold out
            + _bytes((TILE, 128), 4, 2)            # elr out (lane-padded)
            + _bytes((8, F_pad), 4, 2)             # gate
            + _bytes((F_pad, COMB_pad), 2, 2)      # merged weight (bf16)
            + _bytes((H, D, NC_pad), 2, 2)         # lin_w (gat part)
            + _bytes((F_pad, NC_pad), 2, 2)        # lin_w (xse part)
            + _bytes((8, NC_pad), 4, 2)            # lin_b
            + _bytes((TILE, COMB_pad), 4, 2)       # in-kernel temporaries
            + _bytes((TILE, F_pad), 2, 2))

    acc0_p, featf_p, elr_p = pl.pallas_call(
        partial(prep_kernel, num_heads=H, head_dim=D, hd=HD),
        out_shape=(jax.ShapeDtypeStruct((N_pad, NC_pad), jnp.float32),
                   jax.ShapeDtypeStruct((H, N_pad, NC_pad), jnp.bfloat16),
                   jax.ShapeDtypeStruct((N_pad, 2 * H), jnp.float32)),
        grid_spec=pltpu.PrefetchScalarGridSpec(
            num_scalar_prefetch=0,
            grid=grid,
            in_specs=[pl.BlockSpec((TILE, F_pad), lambda i: (i, 0)),
                      pl.BlockSpec((1, F_pad), lambda i: (0, 0)),
                      pl.BlockSpec((F_pad, COMB_pad), lambda i: (0, 0)),
                      pl.BlockSpec((H, D, NC_pad), lambda i: (0, 0, 0)),
                      pl.BlockSpec((F_pad, NC_pad), lambda i: (0, 0)),
                      pl.BlockSpec((1, NC_pad), lambda i: (0, 0))],
            out_specs=[pl.BlockSpec((TILE, NC_pad), lambda i: (i, 0)),
                       pl.BlockSpec((H, TILE, NC_pad), lambda i: (0, i, 0)),
                       pl.BlockSpec((TILE, 2 * H), lambda i: (i, 0))]),
        compiler_params=_mosaic_params(est1, ceiling),
    )(x_p, gate_p, w_comb_p, lin_w_gat_p, lin_w_x_p, lin_b_p)

    # Only relayout glue left: transpose the tiny (N, H) el column block.
    el_t = jnp.transpose(elr_p[:, :H])                                 # (H, N_pad)

    # ---------------- kernel 2: masked attention + accumulate ----------------
    out_p = pl.pallas_call(
        partial(gat_kernel, num_heads=H),
        out_shape=jax.ShapeDtypeStruct((N_pad, NC_pad), jnp.float32),
        grid_spec=pltpu.PrefetchScalarGridSpec(
            num_scalar_prefetch=0,
            grid=grid,
            in_specs=[pl.BlockSpec((TILE, N_pad), lambda i: (i, 0)),      # int8 mask
                      pl.BlockSpec((TILE, 2 * H), lambda i: (i, 0)),      # el/er rows
                      pl.BlockSpec((TILE, NC_pad), lambda i: (i, 0)),     # acc0 rows
                      pl.BlockSpec((H, N_pad), lambda i: (0, 0)),         # el_t (resident)
                      pl.BlockSpec((H, N_pad, NC_pad), lambda i: (0, 0, 0))],  # feat_fold
            out_specs=pl.BlockSpec((TILE, NC_pad), lambda i: (i, 0))),
        compiler_params=_mosaic_params(est2_fn(TILE, N_pad), ceiling),
    )(mask, elr_p, acc0_p, el_t, featf_p)

    return out_p[:N, :nclass]


# --------------------------------------------------------------------------
# Pure-JAX reference (f32, mirrors the PyTorch module semantics)
# --------------------------------------------------------------------------
def reference_forward(x_bLF, adj, params, *, num_heads, head_dim):
    B, L, F = x_bLF.shape
    x = x_bLF.astype(jnp.float32).reshape(B * L, F)
    y = jnp.mean(x, axis=0, keepdims=True)
    h1 = jnp.maximum(y @ params["se_w1"] + params["se_b1"], 0.0)
    gate = jax.nn.sigmoid(h1 @ params["se_w2"] + params["se_b2"])
    xse = x * gate
    feat = xse @ params["gat_w"]
    el = feat @ params["attn_l_bd"]
    er = feat @ params["attn_r_bd"]
    mask = adj > 0
    outs = []
    for h in range(num_heads):
        e = er[:, h:h + 1] + el[:, h:h + 1].T
        e = jnp.where(e >= 0.0, e, NEG_SLOPE * e)
        e = jnp.where(mask, e, -1e30)
        p = jnp.exp(e - jnp.max(e, axis=1, keepdims=True))
        p = jnp.where(mask, p, 0.0)
        alpha = p / jnp.sum(p, axis=1, keepdims=True)
        outs.append(alpha @ feat[:, h * head_dim:(h + 1) * head_dim])
    gat_out = jnp.concatenate(outs, axis=1) + params["gat_b"]
    cat = jnp.concatenate([gat_out, xse], axis=1)
    return cat @ params["lin_w"] + params["lin_b"]


def _block_diag_attn(attn):
    # (H, D) attention vectors -> block-diagonal (H*D, H) so el = feat @ bd
    H, D = attn.shape
    bd = jnp.zeros((H * D, H), jnp.float32)
    for h in range(H):
        bd = bd.at[h * D:(h + 1) * D, h].set(attn[h])
    return bd


if __name__ == "__main__":
    # Small synthetic shapes consistent with the module (real model: F=2614):
    B, L = 2, 96          # -> N = 192 nodes
    nfeat = 64
    nhidden = 32          # GAT head dim
    num_heads = 4
    nclass = 2
    reduction = 16
    N = B * L

    key = jax.random.PRNGKey(0)
    ks = jax.random.split(key, 12)

    x = jax.random.normal(ks[0], (B, L, nfeat), jnp.float32)

    # dense int8 adjacency with self-loops (dgl.add_self_loop equivalent)
    adj_bool = jax.random.uniform(ks[1], (N, N)) < 0.15
    adj = jnp.logical_or(adj_bool, jnp.eye(N, dtype=bool)).astype(jnp.int8)

    sc = 0.1
    params = {
        # SELayer fc: Linear(F, F//16) -> ReLU -> Linear(F//16, F) -> Sigmoid
        "se_w1": sc * jax.random.normal(ks[2], (nfeat, nfeat // reduction), jnp.float32),
        "se_b1": sc * jax.random.normal(ks[3], (1, nfeat // reduction), jnp.float32),
        "se_w2": sc * jax.random.normal(ks[4], (nfeat // reduction, nfeat), jnp.float32),
        "se_b2": sc * jax.random.normal(ks[5], (1, nfeat), jnp.float32),
        # GATConv: fc (F -> H*D, no bias), attn_l/attn_r (H, D), output bias (H*D,)
        "gat_w": sc * jax.random.normal(ks[6], (nfeat, num_heads * nhidden), jnp.float32),
        "attn_l_bd": _block_diag_attn(sc * jax.random.normal(ks[7], (num_heads, nhidden), jnp.float32)),
        "attn_r_bd": _block_diag_attn(sc * jax.random.normal(ks[8], (num_heads, nhidden), jnp.float32)),
        "gat_b": sc * jax.random.normal(ks[9], (1, num_heads * nhidden), jnp.float32),
        # Final Linear(H*D + F, nclass)
        "lin_w": sc * jax.random.normal(ks[10], (num_heads * nhidden + nfeat, nclass), jnp.float32),
        "lin_b": sc * jax.random.normal(ks[11], (1, nclass), jnp.float32),
    }

    out = deephotresi_forward(x, adj, params, num_heads=num_heads, head_dim=nhidden)
    out = jax.block_until_ready(out)

    ref = reference_forward(x, adj, params, num_heads=num_heads, head_dim=nhidden)
    assert out.shape == (N, nclass)
    assert bool(jnp.all(jnp.isfinite(out)))
    # All matmuls run in bf16 on the MXU (f32 accumulation) + approx EUP
    # reciprocal -> compare against the f32 reference with a relaxed tolerance.
    assert jnp.allclose(out, ref, rtol=4e-2, atol=4e-2), "mismatch vs JAX reference"

    print("KERNEL_OK")
</pallas_src>

<mosaic_0001>
module attributes {stable_mosaic.version = 11 : i64} {
  func.func @prep_kernel(%arg0: i32, %arg1: memref<96x128xf32, #tpu.memory_space<vmem>>, %arg2: memref<1x128xf32, #tpu.memory_space<vmem>>, %arg3: memref<128x256xbf16, #tpu.memory_space<vmem>>, %arg4: memref<4x32x128xbf16, #tpu.memory_space<vmem>>, %arg5: memref<128x128xbf16, #tpu.memory_space<vmem>>, %arg6: memref<1x128xf32, #tpu.memory_space<vmem>>, %arg7: memref<96x128xf32, #tpu.memory_space<vmem>>, %arg8: memref<4x96x128xbf16, #tpu.memory_space<vmem>>, %arg9: memref<96x8xf32, #tpu.memory_space<vmem>>) attributes {dimension_semantics = [#tpu.dimension_semantics<parallel>], iteration_bounds = array<i64: 2>, scalar_prefetch = 0 : i64, scratch_operands = 0 : i64, tpu.core_type = #tpu.core_type<tc>, window_params = [{transform_indices = @transform_0, window_bounds = array<i64: 96, 128>}, {pipeline_mode = #tpu.pipeline_mode<synchronous>, transform_indices = @transform_1, window_bounds = array<i64: 1, 128>}, {pipeline_mode = #tpu.pipeline_mode<synchronous>, transform_indices = @transform_2, window_bounds = array<i64: 128, 256>}, {pipeline_mode = #tpu.pipeline_mode<synchronous>, transform_indices = @transform_3, window_bounds = array<i64: 4, 32, 128>}, {pipeline_mode = #tpu.pipeline_mode<synchronous>, transform_indices = @transform_4, window_bounds = array<i64: 128, 128>}, {pipeline_mode = #tpu.pipeline_mode<synchronous>, transform_indices = @transform_5, window_bounds = array<i64: 1, 128>}, {transform_indices = @transform_6, window_bounds = array<i64: 96, 128>}, {transform_indices = @transform_7, window_bounds = array<i64: 4, 96, 128>}, {transform_indices = @transform_8, window_bounds = array<i64: 96, 8>}]} {
    %c0 = arith.constant 0 : index
    %c0_0 = arith.constant 0 : index
    %0 = vector.load %arg1[%c0, %c0_0] : memref<96x128xf32, #tpu.memory_space<vmem>>, vector<96x128xf32>
    %c0_1 = arith.constant 0 : index
    %c0_2 = arith.constant 0 : index
    %1 = vector.load %arg2[%c0_1, %c0_2] : memref<1x128xf32, #tpu.memory_space<vmem>>, vector<1x128xf32>
    %2 = vector.broadcast %1 : vector<1x128xf32> to vector<96x128xf32>
    %3 = arith.mulf %0, %2 : vector<96x128xf32>
    %4 = arith.truncf %3 : vector<96x128xf32> to vector<96x128xbf16>
    %c0_3 = arith.constant 0 : index
    %c0_4 = arith.constant 0 : index
    %5 = vector.load %arg3[%c0_3, %c0_4] : memref<128x256xbf16, #tpu.memory_space<vmem>>, vector<128x256xbf16>
    %cst = arith.constant dense<0.000000e+00> : vector<96x256xf32>
    %6 = tpu.matmul %4, %5, %cst {dimension_numbers = #tpu.dot_dimension_numbers<[1], [0], [0], [1], [0, 0, 1, 1], [], []>} : vector<96x128xbf16>, vector<128x256xbf16>, vector<96x256xf32> -> vector<96x256xf32>
    %7 = vector.extract_strided_slice %6 {offsets = [0, 128], sizes = [96, 8], strides = [1, 1]} : vector<96x256xf32> to vector<96x8xf32>
    %c0_5 = arith.constant 0 : index
    %c0_6 = arith.constant 0 : index
    %8 = vector.load %arg9[%c0_5, %c0_6] : memref<96x8xf32, #tpu.memory_space<vmem>>, vector<96x8xf32>
    tpu.vector_store %arg9[%c0_5, %c0_6], %7 {strides = array<i32>} : memref<96x8xf32, #tpu.memory_space<vmem>>, vector<96x8xf32>,
    %c0_7 = arith.constant 0 : index
    %c0_8 = arith.constant 0 : index
    %9 = vector.load %arg5[%c0_7, %c0_8] : memref<128x128xbf16, #tpu.memory_space<vmem>>, vector<128x128xbf16>
    %cst_9 = arith.constant dense<0.000000e+00> : vector<96x128xf32>
    %10 = tpu.matmul %4, %9, %cst_9 {dimension_numbers = #tpu.dot_dimension_numbers<[1], [0], [0], [1], [0, 0, 1, 1], [], []>} : vector<96x128xbf16>, vector<128x128xbf16>, vector<96x128xf32> -> vector<96x128xf32>
    %c0_10 = arith.constant 0 : index
    %c0_11 = arith.constant 0 : index
    %11 = vector.load %arg6[%c0_10, %c0_11] : memref<1x128xf32, #tpu.memory_space<vmem>>, vector<1x128xf32>
    %12 = vector.broadcast %11 : vector<1x128xf32> to vector<96x128xf32>
    %13 = arith.addf %10, %12 : vector<96x128xf32>
    %c0_12 = arith.constant 0 : index
    %c0_13 = arith.constant 0 : index
    %14 = vector.load %arg7[%c0_12, %c0_13] : memref<96x128xf32, #tpu.memory_space<vmem>>, vector<96x128xf32>
    tpu.vector_store %arg7[%c0_12, %c0_13], %13 {strides = array<i32>} : memref<96x128xf32, #tpu.memory_space<vmem>>, vector<96x128xf32>,
    %15 = vector.extract_strided_slice %6 {offsets = [0, 0], sizes = [96, 128], strides = [1, 1]} : vector<96x256xf32> to vector<96x128xf32>
    %16 = arith.truncf %15 : vector<96x128xf32> to vector<96x128xbf16>
    %17 = vector.extract_strided_slice %16 {offsets = [0, 0], sizes = [96, 32], strides = [1, 1]} : vector<96x128xbf16> to vector<96x32xbf16>
    %c0_14 = arith.constant 0 : index
    %c0_15 = arith.constant 0 : index
    %c0_16 = arith.constant 0 : index
    %18 = vector.load %arg4[%c0_14, %c0_15, %c0_16] : memref<4x32x128xbf16, #tpu.memory_space<vmem>>, vector<1x32x128xbf16>
    %19 = vector.shape_cast %18 : vector<1x32x128xbf16> to vector<32x128xbf16>
    %cst_17 = arith.constant dense<0.000000e+00> : vector<96x128xf32>
    %20 = tpu.matmul %17, %19, %cst_17 {dimension_numbers = #tpu.dot_dimension_numbers<[1], [0], [0], [1], [0, 0, 1, 1], [], []>} : vector<96x32xbf16>, vector<32x128xbf16>, vector<96x128xf32> -> vector<96x128xf32>
    %21 = arith.truncf %20 : vector<96x128xf32> to vector<96x128xbf16>
    %c0_18 = arith.constant 0 : index
    %c0_19 = arith.constant 0 : index
    %c0_20 = arith.constant 0 : index
    %22 = vector.load %arg8[%c0_18, %c0_19, %c0_20] : memref<4x96x128xbf16, #tpu.memory_space<vmem>>, vector<1x96x128xbf16>
    %23 = vector.shape_cast %22 : vector<1x96x128xbf16> to vector<96x128xbf16>
    %24 = vector.shape_cast %21 : vector<96x128xbf16> to vector<1x96x128xbf16>
    tpu.vector_store %arg8[%c0_18, %c0_19, %c0_20], %24 {strides = array<i32>} : memref<4x96x128xbf16, #tpu.memory_space<vmem>>, vector<1x96x128xbf16>,
    %25 = vector.extract_strided_slice %16 {offsets = [0, 32], sizes = [96, 32], strides = [1, 1]} : vector<96x128xbf16> to vector<96x32xbf16>
    %c1 = arith.constant 1 : index
    %c0_21 = arith.constant 0 : index
    %c0_22 = arith.constant 0 : index
    %26 = vector.load %arg4[%c1, %c0_21, %c0_22] : memref<4x32x128xbf16, #tpu.memory_space<vmem>>, vector<1x32x128xbf16>
    %27 = vector.shape_cast %26 : vector<1x32x128xbf16> to vector<32x128xbf16>
    %cst_23 = arith.constant dense<0.000000e+00> : vector<96x128xf32>
    %28 = tpu.matmul %25, %27, %cst_23 {dimension_numbers = #tpu.dot_dimension_numbers<[1], [0], [0], [1], [0, 0, 1, 1], [], []>} : vector<96x32xbf16>, vector<32x128xbf16>, vector<96x128xf32> -> vector<96x128xf32>
    %29 = arith.truncf %28 : vector<96x128xf32> to vector<96x128xbf16>
    %c1_24 = arith.constant 1 : index
    %c0_25 = arith.constant 0 : index
    %c0_26 = arith.constant 0 : index
    %30 = vector.load %arg8[%c1_24, %c0_25, %c0_26] : memref<4x96x128xbf16, #tpu.memory_space<vmem>>, vector<1x96x128xbf16>
    %31 = vector.shape_cast %30 : vector<1x96x128xbf16> to vector<96x128xbf16>
    %32 = vector.shape_cast %29 : vector<96x128xbf16> to vector<1x96x128xbf16>
    tpu.vector_store %arg8[%c1_24, %c0_25, %c0_26], %32 {strides = array<i32>} : memref<4x96x128xbf16, #tpu.memory_space<vmem>>, vector<1x96x128xbf16>,
    %33 = vector.extract_strided_slice %16 {offsets = [0, 64], sizes = [96, 32], strides = [1, 1]} : vector<96x128xbf16> to vector<96x32xbf16>
    %c2 = arith.constant 2 : index
    %c0_27 = arith.constant 0 : index
    %c0_28 = arith.constant 0 : index
    %34 = vector.load %arg4[%c2, %c0_27, %c0_28] : memref<4x32x128xbf16, #tpu.memory_space<vmem>>, vector<1x32x128xbf16>
    %35 = vector.shape_cast %34 : vector<1x32x128xbf16> to vector<32x128xbf16>
    %cst_29 = arith.constant dense<0.000000e+00> : vector<96x128xf32>
    %36 = tpu.matmul %33, %35, %cst_29 {dimension_numbers = #tpu.dot_dimension_numbers<[1], [0], [0], [1], [0, 0, 1, 1], [], []>} : vector<96x32xbf16>, vector<32x128xbf16>, vector<96x128xf32> -> vector<96x128xf32>
    %37 = arith.truncf %36 : vector<96x128xf32> to vector<96x128xbf16>
    %c2_30 = arith.constant 2 : index
    %c0_31 = arith.constant 0 : index
    %c0_32 = arith.constant 0 : index
    %38 = vector.load %arg8[%c2_30, %c0_31, %c0_32] : memref<4x96x128xbf16, #tpu.memory_space<vmem>>, vector<1x96x128xbf16>
    %39 = vector.shape_cast %38 : vector<1x96x128xbf16> to vector<96x128xbf16>
    %40 = vector.shape_cast %37 : vector<96x128xbf16> to vector<1x96x128xbf16>
    tpu.vector_store %arg8[%c2_30, %c0_31, %c0_32], %40 {strides = array<i32>} : memref<4x96x128xbf16, #tpu.memory_space<vmem>>, vector<1x96x128xbf16>,
    %41 = vector.extract_strided_slice %16 {offsets = [0, 96], sizes = [96, 32], strides = [1, 1]} : vector<96x128xbf16> to vector<96x32xbf16>
    %c3 = arith.constant 3 : index
    %c0_33 = arith.constant 0 : index
    %c0_34 = arith.constant 0 : index
    %42 = vector.load %arg4[%c3, %c0_33, %c0_34] : memref<4x32x128xbf16, #tpu.memory_space<vmem>>, vector<1x32x128xbf16>
    %43 = vector.shape_cast %42 : vector<1x32x128xbf16> to vector<32x128xbf16>
    %cst_35 = arith.constant dense<0.000000e+00> : vector<96x128xf32>
    %44 = tpu.matmul %41, %43, %cst_35 {dimension_numbers = #tpu.dot_dimension_numbers<[1], [0], [0], [1], [0, 0, 1, 1], [], []>} : vector<96x32xbf16>, vector<32x128xbf16>, vector<96x128xf32> -> vector<96x128xf32>
    %45 = arith.truncf %44 : vector<96x128xf32> to vector<96x128xbf16>
    %c3_36 = arith.constant 3 : index
    %c0_37 = arith.constant 0 : index
    %c0_38 = arith.constant 0 : index
    %46 = vector.load %arg8[%c3_36, %c0_37, %c0_38] : memref<4x96x128xbf16, #tpu.memory_space<vmem>>, vector<1x96x128xbf16>
    %47 = vector.shape_cast %46 : vector<1x96x128xbf16> to vector<96x128xbf16>
    %48 = vector.shape_cast %45 : vector<96x128xbf16> to vector<1x96x128xbf16>
    tpu.vector_store %arg8[%c3_36, %c0_37, %c0_38], %48 {strides = array<i32>} : memref<4x96x128xbf16, #tpu.memory_space<vmem>>, vector<1x96x128xbf16>,
    return
  }
  func.func @transform_0(%arg0: i32) -> (i32, i32) {
    %c0_i32 = arith.constant 0 : i32
    %c0_i32_0 = arith.constant 0 : i32
    return %arg0, %c0_i32 : i32, i32
  }
  func.func @transform_1(%arg0: i32) -> (i32, i32) {
    %c0_i32 = arith.constant 0 : i32
    %c0_i32_0 = arith.constant 0 : i32
    %c0_i32_1 = arith.constant 0 : i32
    return %c0_i32, %c0_i32_0 : i32, i32
  }
  func.func @transform_2(%arg0: i32) -> (i32, i32) {
    %c0_i32 = arith.constant 0 : i32
    %c0_i32_0 = arith.constant 0 : i32
    %c0_i32_1 = arith.constant 0 : i32
    return %c0_i32, %c0_i32_0 : i32, i32
  }
  func.func @transform_3(%arg0: i32) -> (i32, i32, i32) {
    %c0_i32 = arith.constant 0 : i32
    %c0_i32_0 = arith.constant 0 : i32
    %c0_i32_1 = arith.constant 0 : i32
    %c0_i32_2 = arith.constant 0 : i32
    return %c0_i32, %c0_i32_0, %c0_i32_1 : i32, i32, i32
  }
  func.func @transform_4(%arg0: i32) -> (i32, i32) {
    %c0_i32 = arith.constant 0 : i32
    %c0_i32_0 = arith.constant 0 : i32
    %c0_i32_1 = arith.constant 0 : i32
    return %c0_i32, %c0_i32_0 : i32, i32
  }
  func.func @transform_5(%arg0: i32) -> (i32, i32) {
    %c0_i32 = arith.constant 0 : i32
    %c0_i32_0 = arith.constant 0 : i32
    %c0_i32_1 = arith.constant 0 : i32
    return %c0_i32, %c0_i32_0 : i32, i32
  }
  func.func @transform_6(%arg0: i32) -> (i32, i32) {
    %c0_i32 = arith.constant 0 : i32
    %c0_i32_0 = arith.constant 0 : i32
    return %arg0, %c0_i32 : i32, i32
  }
  func.func @transform_7(%arg0: i32) -> (i32, i32, i32) {
    %c0_i32 = arith.constant 0 : i32
    %c0_i32_0 = arith.constant 0 : i32
    %c0_i32_1 = arith.constant 0 : i32
    return %c0_i32, %arg0, %c0_i32_0 : i32, i32, i32
  }
  func.func @transform_8(%arg0: i32) -> (i32, i32) {
    %c0_i32 = arith.constant 0 : i32
    %c0_i32_0 = arith.constant 0 : i32
    return %arg0, %c0_i32 : i32, i32
  }
}

</mosaic_0001>

<bundles_post_ra>
// kernel: tpu_custom_call.1
= control target key start
LH: loop header
LB: loop body
LE: loop exit
PB: predicated region body
PF: predicated region fallthrough
CT: control target
= control target key end

     0   :  { %s3137_s0 = inlined_call_operand.hbm [shape: f32[192,128], index: 0, kind: input, shape index: {}]   ;;  %s3138_s1 = inlined_call_operand.vmem [shape: f32[1,128], index: 1, kind: input, shape index: {}]   ;;  %s3139_s2 = inlined_call_operand.hbm [shape: bf16[128,256], index: 2, kind: input, shape index: {}]   ;;  %s3140_s3 = inlined_call_operand.hbm [shape: bf16[4,32,128], index: 3, kind: input, shape index: {}]   ;;  %s3141_s4 = inlined_call_operand.hbm [shape: bf16[128,128], index: 4, kind: input, shape index: {}]   ;;  %s3142_s5 = inlined_call_operand.vmem [shape: f32[1,128], index: 5, kind: input, shape index: {}]   ;;  %s3143_s6 = inlined_call_operand.hbm [shape: f32[192,128], index: 6, kind: output, shape index: {0}]   ;;  %s3144_s7 = inlined_call_operand.hbm [shape: bf16[4,192,128], index: 7, kind: output, shape index: {1}]   ;;  %s3145_s8 = inlined_call_operand.vmem [shape: f32[192,8], index: 8, kind: output, shape index: {2}]  }
   0x1   :  { %3153 = sst [smem:[#allocation22_spill]] %s3139_s2 }
   0x2   :  { %14 = vsyncpa [#allocation3], 0 }
   0x3   :  { %16 = vsyncpa [#allocation3 + $0x1], 0 }
   0x4   :  { %17 = vsyncpa [#allocation6], 0 }
   0x5   :  { %18 = vsyncpa [#allocation9], 0 }
   0x6   :  { %19 = vsyncpa [#allocation4], 0 }
   0x7   :  { %21 = vsyncpa [#allocation4 + $0x1], 0 }
   0x8   :  { %22 = vsyncpa [#allocation12], 0 }
   0x9   :  { %24 = vsyncpa [#allocation12 + $0x1], 0  ;;  %s2689_s27 = smov 0   ;;  %s2691_s28 = smov 0  }
   0xa   :  { %s2693_s29 = smov 0   ;;  %s2695_s30 = smov 0  }
   0xb LB: > { %3154 = sst [smem:[#allocation20_spill]] %s2608_s27  ;;  %s2710_s9 = sadd.s32 4294967295, %s2620_s30   ;;  %s2620_s30 = sphi %s2695_s30, %s3180_s30   ;;  %s2616_s29 = sphi %s2693_s29, %s3179_s29   ;;  %s2612_s28 = sphi %s2691_s28, %s3178_s28   ;;  %s2608_s27 = sphi %s2689_s27, %s3177_s27  }
   0xc   : > { %s1786_s10 = sadd.s32 4294967294, %s2620_s30   ;;  %p50_p0 = scmp.ne.s32.totalorder %s2612_s28, %s2608_s27 }
   0xd   : > { %p3146_p1 = scmp.eq.s32.totalorder %s2710_s9, 0  ;;  %p185_p3 = scmp.eq.s32.totalorder %s1786_s10, 1 }
   0xe   : > { %p1787_p5 = scmp.ge.s32.totalorder %s2620_s30, 1  ;;  %p244_p7 = scmp.lt.s32.totalorder %s2620_s30, 3 }
   0xf   : > { %p2719_p4 = por %p3146_p1, %p50_p0  ;;  %p2724_p6 = por %p185_p3, %p50_p0 }
  0x10   : > { %p2729_p8 = pnand %p1787_p5, %p244_p7  ;;  %s2622_s14 = smov [#allocation5]  }
  0x11   : > { %s3155_s11 = scalar_select %p2719_p4, 1, 0 }
  0x12   : > { %s3156_s12 = scalar_select %p2724_p6, 1, 0 }
  0x13   : > { %s3158_s13 = scalar_select %p2729_p8, 1, 0 }
  0x14   : > { %3157 = sst [smem:[#allocation21_spill]] %s3156_s12  ;;  %s259_s15 = sshll.u32 %s2622_s14, 4  ;;  %s2733_s15 = int_to_ptr.vmem [resolvable:$true] %s259_s15 }
  0x15   : > { %p2307_p9 = pneg %p2729_p8  ;;  %s2623_s17 = smov [#allocation7]  }
  0x16   : > { %s272_s18 = sshll.u32 %s2623_s17, 4  ;;  %s3160_s2 = sld [smem:[#allocation22_spill]]  ;;  %s2744_s18 = int_to_ptr.vmem [resolvable:$true] %s272_s18 }
  0x17   : > { %p2740_p11 = pnand %p2307_p9, %p3146_p1 }
  0x19   : > { %p2754_p13 = pneg %p2740_p11 }
  0x1c   : > { %s2428_s21 = scalar_lea.hbm %s3160_s2, 2048 }
  0x1d   : > { %p2429_p12 = scmp.ne.s32.totalorder %s3160_s2, %s2428_s21  ;;  %p2435_p5 = scmp.lt.u32.totalorder %s2428_s21, %s3160_s2 }
  0x1f   : > { %p2431_p0 = pnand %p2754_p13, %p2429_p12 }
  0x21   : > { %p2432_p3 = pneg %p2431_p0 }
  0x23   : > { %p2437_p7 = pnand %p2435_p5, %p2432_p3 }
  0x25   : > { %2440 = shalt.err (!%p2437_p7)
}
  0x26   : > { %s2441_s10 = scalar_lea.vmem %s2733_s15, 2048  ;;  %p2449_p2 = scmp.lt.s32.totalorder %s2733_s15, %s2733_s15 }
  0x27   : > { %p2442_p9 = scmp.ne.s32.totalorder %s2733_s15, %s2441_s10  ;;  %p2450_p6 = scmp.lt.s32.totalorder %s2441_s10, %s2441_s10 }
  0x29   : > { %p2444_p10 = pnand %p2442_p9, %p2754_p13  ;;  %p2451_p12 = por %p2450_p6, %p2449_p2 }
  0x2b   : > { %p2445_p1 = pneg %p2444_p10 }
  0x2d   : > { %p2452_p0 = pnand %p2451_p12, %p2445_p1 }
  0x2f   : > { %2455 = shalt.err (!%p2452_p0)
}
  0x30   : > { %s3148_s14 = smov 128   ;;  %s3149_s17 = smov 8  }
  0x31   : > { %2310 = dma.hbm_to_vmem [thread:$0]  (!%p2740_p11), %s3160_s2, 2048, %s2733_s15, [#allocation6], %s3148_s14, %s3148_s14, %s3149_s17  }
  0x32   : > { %s2456_s23 = scalar_lea.hbm %s3140_s3, 1024 }
  0x33   : > { %p2457_p1 = scmp.ne.s32.totalorder %s3140_s3, %s2456_s23  ;;  %p2463_p10 = scmp.lt.u32.totalorder %s2456_s23, %s3140_s3 }
  0x35   : > { %p2459_p2 = pnand %p2457_p1, %p2754_p13 }
  0x37   : > { %p2460_p6 = pneg %p2459_p2 }
  0x39   : > { %p2465_p3 = pnand %p2463_p10, %p2460_p6 }
  0x3b   : > { %2468 = shalt.err (!%p2465_p3)
}
  0x3c   : > { %s2469_s15 = scalar_lea.vmem %s2744_s18, 1024  ;;  %p2477_p12 = scmp.lt.s32.totalorder %s2744_s18, %s2744_s18 }
  0x3d   : > { %p2470_p5 = scmp.ne.s32.totalorder %s2744_s18, %s2469_s15  ;;  %p2478_p0 = scmp.lt.s32.totalorder %s2469_s15, %s2469_s15 }
  0x3f   : > { %p2472_p7 = pnand %p2470_p5, %p2754_p13  ;;  %p2479_p1 = por %p2478_p0, %p2477_p12 }
  0x41   : > { %p2473_p9 = pneg %p2472_p7 }
  0x43   : > { %p2480_p2 = pnand %p2479_p1, %p2473_p9 }
  0x45   : > { %2483 = shalt.err (!%p2480_p2)
}
  0x46   : > { %s2626_s19 = smov 64   ;;  %s2627_s12 = smov 4  }
  0x47   : > { %2313 = dma.hbm_to_vmem [thread:$0]  (!%p2740_p11), %s3140_s3, 1024, %s2744_s18, [#allocation6], %s2626_s19, %s2626_s19, %s2627_s12  }
  0x48   : > { %s2628_s22 = smov [#allocation8]   ;;  %s2802_s25 = sadd.s32 1, %s2620_s30  }
  0x49   : > { %s285_s23 = sshll.u32 %s2628_s22, 4  ;;  %s2484_s15 = scalar_lea.hbm %s3141_s4, 1024  ;;  %s286_s23 = int_to_ptr.vmem [resolvable:$true] %s285_s23 }
  0x4a   : > { %p2485_p6 = scmp.ne.s32.totalorder %s3141_s4, %s2484_s15  ;;  %p2491_p5 = scmp.lt.u32.totalorder %s2484_s15, %s3141_s4 }
  0x4c   : > { %p2487_p10 = pnand %p2485_p6, %p2754_p13 }
  0x4e   : > { %p2488_p3 = pneg %p2487_p10 }
  0x50   : > { %p2493_p7 = pnand %p2491_p5, %p2488_p3 }
  0x52   : > { %2496 = shalt.err (!%p2493_p7)
}
  0x53   : > { %s2497_s18 = scalar_lea.vmem %s286_s23, 1024  ;;  %p2505_p1 = scmp.lt.s32.totalorder %s286_s23, %s286_s23 }
  0x54   : > { %p2498_p9 = scmp.ne.s32.totalorder %s286_s23, %s2497_s18  ;;  %p2506_p2 = scmp.lt.s32.totalorder %s2497_s18, %s2497_s18 }
  0x56   : > { %p2500_p12 = pnand %p2498_p9, %p2754_p13  ;;  %p2507_p4 = por %p2506_p2, %p2505_p1 }
  0x58   : > { %p2501_p0 = pneg %p2500_p12 }
  0x5a   : > { %p2508_p8 = pnand %p2507_p4, %p2501_p0 }
  0x5c   : > { %2511 = shalt.err (!%p2508_p8)
}
  0x5d   : > { %2316 = dma.hbm_to_vmem [thread:$0]  (!%p2740_p11), %s3141_s4, 1024, %s286_s23, [#allocation9], %s2626_s19, %s2626_s19, %s2627_s12  }
  0x5e   : > { %s34_s2 = ssub.s32 %s2620_s30, %s2802_s25  ;;  %s37_s27 = sadd.s32 1, %s2616_s29 }
  0x5f   : > { %p35_p4 = scmp.eq.s32.totalorder %s34_s2, 0  ;;  %p44_p8 = scmp.ne.s32.totalorder %s2616_s29, %s2612_s28 }
  0x60   : > { %p45_p13 = scmp.eq.s32.totalorder %s2620_s30, 0  ;;  %p2331_p6 = scmp.lt.s32.totalorder %s2620_s30, 2 }
  0x61   : > { %s2830_s16 = scalar_select %p35_p4, %s2616_s29, %s37_s27  }
  0x62   : > { %p46_p10 = por %p45_p13, %p44_p8  ;;  %p3162_p3 = scmp.eq.s32.totalorder %s2710_s9, 1 }
  0x63   : > { %s302_s20 = sand.u32 1, %s2616_s29   ;;  %s1944_s21 = smul.u32 1536, %s2620_s30 }
  0x64   : > { %p2834_p5 = por %p3162_p3, %p44_p8  ;;  %s2280_s22 = smul.u32 96, %s302_s20 }
  0x65   : > { %p2840_p7 = pnand %p2331_p6, %p46_p10  ;;  %s2847_s23 = scalar_lea.hbm %s3137_s0, %s1944_s21 }
  0x66   : > { %s306_s10 = scalar_lea.vmem [#allocation2], %s2280_s22  ;;  %s2851_s18 = scalar_lea.sflag [#allocation3], %s302_s20 }
  0x67   : > { %s313_s15 = sshll.u32 %s306_s10, 4  ;;  %s2512_s14 = scalar_lea.hbm %s2847_s23, 1536  ;;  %s2849_s15 = int_to_ptr.vmem [resolvable:$true] %s313_s15 }
  0x68   : > { %p2513_p11 = scmp.ne.s32.totalorder %s2847_s23, %s2512_s14  ;;  %p2514_p9 = pneg %p2840_p7 }
  0x69   : > { %s2517_s27 = scalar_lea.hbm %s3137_s0, 3072  ;;  %p2518_p1 = scmp.lt.u32.totalorder %s2847_s23, %s3137_s0 }
  0x6a   : > { %p2515_p12 = pnand %p2514_p9, %p2513_p11  ;;  %p2519_p2 = scmp.lt.u32.totalorder %s2517_s27, %s2512_s14 }
  0x6b   : > { %p2521_p8 = scmp.lt.u32.totalorder %s2512_s14, %s2847_s23 }
  0x6c   : > { %p2516_p0 = pneg %p2515_p12  ;;  %p2520_p4 = por %p2519_p2, %p2518_p1 }
  0x6e   : > { %p2522_p13 = por %p2521_p8, %p2520_p4 }
  0x70   : > { %p2523_p6 = pnand %p2522_p13, %p2516_p0 }
  0x72   : > { %2526 = shalt.err (!%p2523_p6)
}
  0x73   : > { %s2527_s20 = scalar_lea.vmem %s2849_s15, 1536  ;;  %s2629_s22 = smov [#allocation2]  }
  0x74   : > { %p2528_p10 = scmp.ne.s32.totalorder %s2849_s15, %s2527_s20  ;;  %s2532_s12 = sshll.u32 %s2629_s22, 4  ;;  %s2533_s12 = int_to_ptr.vmem [resolvable:$false] %s2532_s12 }
  0x75   : > { %s2534_s10 = scalar_lea.vmem %s2533_s12, 3072  ;;  %p2535_p12 = scmp.lt.s32.totalorder %s2849_s15, %s2533_s12 }
  0x76   : > { %p2530_p3 = pnand %p2528_p10, %p2514_p9  ;;  %p2536_p1 = scmp.lt.s32.totalorder %s2534_s10, %s2527_s20 }
  0x78   : > { %p2531_p11 = pneg %p2530_p3  ;;  %p2537_p2 = por %p2536_p1, %p2535_p12 }
  0x7a   : > { %p2538_p4 = pnand %p2537_p2, %p2531_p11 }
  0x7c   : > { %2541 = shalt.err (!%p2538_p4)
}
  0x7d   : > { %s3165_s14 = smov 8   ;;  %s3166_s17 = smov 128  }
  0x7e   : > { %2320 = dma.hbm_to_vmem [thread:$0]  (!%p2840_p7), %s2847_s23, 1536, %s2849_s15, %s2851_s18, %s3166_s17, %s3166_s17, %s3165_s14  }
  0x7f   : > { %p3167_p9 = scmp.ne.s32.totalorder %s3158_s13, 0 }
  0x80   : > { %s2885_s2 = sand.u32 (!%p3167_p9), 1, %s2612_s28   ;;  %p3168_p0 = scmp.ne.s32.totalorder (!%p3167_p9), %s3155_s11, 0 }
  0x81   : > { %325 = sbr.rel (%p3167_p9) target bundleno = 798 (0x31e), region = 44  ;;  %s328_s21 = scalar_lea.sflag (!%p3167_p9), [#allocation3], %s2885_s2 }
  0x82   : > { %s2281_s27 = smul.u32 (!%p3167_p9), 96, %s2885_s2 }
  0x84   : > { %s2891_s26 = scalar_lea.vmem (!%p3167_p9), [#allocation2], %s2281_s27 }
  0x88   : > { %2587 = dma.done.wait (%p3168_p0), %s328_s21, 1536  }
  0x89   : > { %2589 = vsyncadd (%p3168_p0), %s328_s21, 4294965760  ;;  %p3169_p7 = scmp.eq.s32.totalorder %s2710_s9, 0 }
  0x8b   : > { %2591 = dma.done.wait (%p3169_p7), [#allocation6], 3072   ;;  %p3170_p8 = pmov %p3169_p7 }
  0x8c   : > { %p3171_p13 = pmov %p3169_p7 }
  0x8d   : > { %2593 = vsyncadd (%p3170_p8), [#allocation6], 4294964224 }
  0x8e   : > { %2595 = dma.done.wait (%p3171_p13), [#allocation9], 1024   ;;  %p3172_p6 = pmov %p3169_p7 }
  0x8f   : > { %v2630_v0 = vmov 0   ;;  %v2388_v1 = vld [vmem:[#allocation5 + $0x4] ss:$8 sps:$4 sm:$0xff]   ;;  %v2390_v2 = vld [vmem:[#allocation5] ss:$8 sps:$4 sm:$0xff]   ;;  %v2414_v21 = vld [vmem:[#allocation8 + $0x10] sm:$0xff]  }
  0x90   : > { %2597 = vsyncadd (%p3172_p6), [#allocation9], 4294966272  ;;  %561 = vmatprep.mubr.bf16.mxu0 %v2630_v0  ;;  %529 = vmatprep.subr.bf16.mxu0 %v2388_v1  ;;  %v2391_v3 = vld [vmem:[#allocation5 + $0x14] ss:$8 sps:$4 sm:$0xff]   ;;  %v2393_v4 = vld [vmem:[#allocation5 + $0x10] ss:$8 sps:$4 sm:$0xff]  }
  0x91   : > { %530 = vmatpush1.bf16.msra.mxu0 %v2390_v2  ;;  %v2394_v5 = vld [vmem:[#allocation5 + $0x24] ss:$8 sps:$4 sm:$0xff]   ;;  %v2396_v6 = vld [vmem:[#allocation5 + $0x20] ss:$8 sps:$4 sm:$0xff]   ;;  %v2397_v7 = vld [vmem:[#allocation5 + $0x34] ss:$8 sps:$4 sm:$0xff]  }
  0x92   : > { %531 = vmatprep.subr.bf16.mxu0 %v2391_v3  ;;  %v396_v8 = vld [vmem:[%s2891_s26] sm:$0xff]  ;;  %v2399_v9 = vld [vmem:[#allocation5 + $0x30] ss:$8 sps:$4 sm:$0xff]   ;;  %v397_v10 = vld [vmem:[%s2891_s26 + $0x8] sm:$0xff]  ;;  %s389_s23 = smul.u32 12, %s2710_s9  ;;  %vm622_vm0 = vcmask 64512  }
  0x93   : > { %v2911_v11 = vld [vmem:[%s3138_s1] ss:$0 sm:$0xff]  ;;  %v2400_v12 = vld [vmem:[#allocation5 + $0x44] ss:$8 sps:$4 sm:$0xff]   ;;  %v2403_v16 = vld [vmem:[#allocation5 + $0x54] ss:$8 sps:$4 sm:$0xff]  }
  0x94   : > { %v415_v13 = vmul.f32 %v2911_v11, %v396_v8  ;;  %v416_v14 = vmul.f32 %v2911_v11, %v397_v10  ;;  %v2402_v15 = vld [vmem:[#allocation5 + $0x40] ss:$8 sps:$4 sm:$0xff]   ;;  %v2405_v20 = vld [vmem:[#allocation5 + $0x50] ss:$8 sps:$4 sm:$0xff]   ;;  %v2406_v22 = vld [vmem:[#allocation5 + $0x64] ss:$8 sps:$4 sm:$0xff]  }
  0x95   : > { %532 = vmatpush1.bf16.msra.mxu0 %v2393_v4  ;;  %v2412_v18 = vld [vmem:[#allocation8] sm:$0xff]   ;;  %v2413_v19 = vld [vmem:[#allocation8 + $0x8] sm:$0xff]   ;;  %v2409_v24 = vld [vmem:[#allocation5 + $0x74] ss:$8 sps:$4 sm:$0xff]   ;;  %p390_p10 = scmp.lt.s32.totalorder %s389_s23, 23  ;;  %vm821_vm1 = vcmask 261120  }
  0x96   : > { %533 = vmatprep.subr.bf16.mxu0 %v2394_v5  ;;  %v427_v17 = vpack.c.bf16 %v416_v14, %v415_v13  ;;  %2184 = vmatprep.subr.bf16.mxu1 %v2412_v18  ;;  %v2408_v23 = vld [vmem:[#allocation5 + $0x60] ss:$8 sps:$4 sm:$0xff]   ;;  %v2415_v25 = vld [vmem:[#allocation8 + $0x18] sm:$0xff]   ;;  %v398_v28 = vld [vmem:[%s2891_s26 + $0x10] sm:$0xff]  ;;  %s2631_s22 = smov 96   ;;  %s2632_s12 = smov 64  }
  0x97   : > { %2185 = vmatpush3.bf16.msra.mxu1 %v2412_v18  ;;  %v2411_v26 = vld [vmem:[#allocation5 + $0x70] ss:$8 sps:$4 sm:$0xff]   ;;  %v2416_v27 = vld [vmem:[#allocation8 + $0x20] sm:$0xff]   ;;  %v2417_v30 = vld [vmem:[#allocation8 + $0x28] sm:$0xff]   ;;  %v417_v31 = vmul.f32 %v2911_v11, %v398_v28  ;;  %s3182_s23 = smov (!%p390_p10, %s389_s23), 23  ;;  %s2633_s10 = smov 32  }
  0x98   : > { %2200 = vmatprep.mubr.bf16.mxu1 %v427_v17  ;;  %2186 = vmatprep.subr.bf16.mxu1 %v2413_v19  ;;  %v399_v29 = vld [vmem:[%s2891_s26 + $0x18] sm:$0xff]  ;;  %v2418_v33 = vld [vmem:[#allocation8 + $0x30] sm:$0xff]   ;;  %v400_v35 = vld [vmem:[%s2891_s26 + $0x20] sm:$0xff]  ;;  %s1797_s15 = sshll.u32 %s3182_s23, 3  ;;  %s3002_s21 = scalar_lea.vmem [#allocation10], %s2281_s27 }
  0x99   : > { %534 = vmatpush1.bf16.msra.mxu0 %v2396_v6  ;;  %v418_v32 = vmul.f32 %v2911_v11, %v399_v29  ;;  %v401_v36 = vld [vmem:[%s2891_s26 + $0x28] sm:$0xff]  ;;  %v2419_v37 = vld [vmem:[#allocation8 + $0x38] sm:$0xff]   ;;  %v419_v38 = vmul.f32 %v2911_v11, %v400_v35  ;;  %v402_v41 = vld [vmem:[%s2891_s26 + $0x30] sm:$0xff]  ;;  %s2944_s20 = scalar_lea.vmem %s3145_s8, %s1797_s15  ;;  %s2282_s27 = smul.u32 192, %s2885_s2 }
  0x9a   : > { %535 = vmatprep.subr.bf16.mxu0 %v2397_v7  ;;  %v420_v39 = vmul.f32 %v2911_v11, %v401_v36  ;;  %v403_v42 = vld [vmem:[%s2891_s26 + $0x38] sm:$0xff]  ;;  %v404_v43 = vld [vmem:[%s2891_s26 + $0x40] sm:$0xff]  ;;  %v405_v44 = vld [vmem:[%s2891_s26 + $0x48] sm:$0xff]  ;;  %v421_v45 = vmul.f32 %v2911_v11, %v402_v41  ;;  %s1993_s11 = smul.u32 1536, %s2710_s9  ;;  %s1578_s13 = sshll.u32 %s3002_s21, 4  ;;  %s3055_s13 = int_to_ptr.vmem [resolvable:$true] %s1578_s13 }
  0x9b   : > { %2187 = vmatpush3.bf16.msra.mxu1 %v2413_v19  ;;  %v428_v34 = vpack.c.bf16 %v418_v32, %v417_v31  ;;  %v422_v46 = vmul.f32 %v2911_v11, %v403_v42  ;;  %v423_v47 = vmul.f32 %v2911_v11, %v404_v43  ;;  %v424_v48 = vmul.f32 %v2911_v11, %v405_v44  ;;  %v406_v51 = vld [vmem:[%s2891_s26 + $0x50] sm:$0xff]  ;;  %v407_v52 = vld [vmem:[%s2891_s26 + $0x58] sm:$0xff]  ;;  %v2420_v56 = vld [vmem:[#allocation7] sm:$0xff]   ;;  %s3040_s26 = scalar_lea.vmem [#allocation11], %s2282_s27  ;;  %s1555_s19 = scalar_lea.sflag [#allocation4], %s2885_s2 }
  0x9c   : > { %2188 = vmatprep.subr.bf16.mxu1 %v2414_v21  ;;  %v429_v40 = vpack.c.bf16 %v420_v39, %v419_v38  ;;  %v425_v53 = vmul.f32 %v2911_v11, %v406_v51  ;;  %v426_v54 = vmul.f32 %v2911_v11, %v407_v52  ;;  %v2421_v57 = vld [vmem:[#allocation7 + $0x8] sm:$0xff]   ;;  %v2422_v58 = vld [vmem:[#allocation7 + $0x10] sm:$0xff]   ;;  %v2423_v59 = vld [vmem:[#allocation7 + $0x18] sm:$0xff]   ;;  %s3053_s18 = scalar_lea.hbm %s3143_s6, %s1993_s11 }
  0x9d   : > { %536 = vmatpush1.bf16.msra.mxu0 %v2399_v9  ;;  %v430_v49 = vpack.c.bf16 %v422_v46, %v421_v45  ;;  %v431_v50 = vpack.c.bf16 %v424_v48, %v423_v47  ;;  %v2965_v11 = vld [vmem:[#allocation7 + $0x20] sm:$0xff]  }
  0x9e   : > { %537 = vmatprep.subr.bf16.mxu0 %v2400_v12  ;;  %v432_v55 = vpack.c.bf16 %v426_v54, %v425_v53  ;;  %v1815_v29 = vld [vmem:[%s3142_s5] ss:$0 sm:$0xff] }
  0x9f   : > { %2189 = vmatpush3.bf16.msra.mxu1 %v2414_v21 }
  0xa0   : > { %2190 = vmatprep.subr.bf16.mxu1 %v2415_v25 }
  0xa1   : > { %538 = vmatpush1.bf16.msra.mxu0 %v2402_v15 }
  0xa2   : > { %539 = vmatprep.subr.bf16.mxu0 %v2403_v16 }
  0xa3   : > { %2191 = vmatpush3.bf16.msra.mxu1 %v2415_v25 }
  0xa4   : > { %2192 = vmatprep.subr.bf16.mxu1 %v2416_v27 }
  0xa5   : > { %540 = vmatpush1.bf16.msra.mxu0 %v2405_v20 }
  0xa6   : > { %541 = vmatprep.subr.bf16.mxu0 %v2406_v22 }
  0xa7   : > { %2193 = vmatpush3.bf16.msra.mxu1 %v2416_v27 }
  0xa8   : > { %2194 = vmatprep.subr.bf16.mxu1 %v2417_v30 }
  0xa9   : > { %542 = vmatpush1.bf16.msra.mxu0 %v2408_v23 }
  0xaa   : > { %543 = vmatprep.subr.bf16.mxu0 %v2409_v24 }
  0xab   : > { %2195 = vmatpush3.bf16.msra.mxu1 %v2417_v30 }
  0xac   : > { %2196 = vmatprep.subr.bf16.mxu1 %v2418_v33 }
  0xad   : > { %544 = vmatpush1.bf16.msra.mxu0 %v2411_v26 }
  0xae   : > { %2228 = vmatprep.subr.bf16.mxu0 %v2422_v58 }
  0xaf   : > { %2197 = vmatpush3.bf16.msra.mxu1 %v2418_v33 }
  0xb0   : > { %562 = vmatmul.mubr.bf16.vlgmr.msra.gmra.mrb[0].mxu0 %v427_v17  ;;  %2198 = vmatprep.subr.bf16.mxu1 %v2419_v37  ;;  %v2972_v17 = vld [vmem:[#allocation7 + $0x30] sm:$0xff]  }
  0xb1   : > { %571 = vmatprep.mubr.bf16.mxu0 %v2630_v0  ;;  %2229 = vmatpush3.bf16.msra.mxu0 %v2422_v58 }
  0xb2   : > { %2230 = vmatprep.subr.bf16.mxu0 %v2423_v59 }
  0xb3   : > { %2199 = vmatpush3.bf16.msra.mxu1 %v2419_v37 }
  0xb4   : > { %2212 = vmatprep.subr.bf16.mxu1 %v2420_v56 }
  0xb5   : > { %2231 = vmatpush3.bf16.msra.mxu0 %v2423_v59 }
  0xb6   : > { %2201 = vmatmul.mubr.bf16.vlgmr.msra.gmra.mrb[0].mxu1 %v428_v34  ;;  %2260 = vmatprep.subr.bf16.mxu0 %v2972_v17 }
  0xb7   : > { %2204 = vmatprep.mubr.bf16.mxu1 %v429_v40  ;;  %2213 = vmatpush3.bf16.msra.mxu1 %v2420_v56 }
  0xb8   : > { %572 = vmatmul.mubr.bf16.gmra.mrb[4].mxu0 %v428_v34  ;;  %2214 = vmatprep.subr.bf16.mxu1 %v2421_v57 }
  0xb9   : > { %581 = vmatprep.mubr.bf16.mxu0 %v2630_v0 }
  0xbb   : > { %2215 = vmatpush3.bf16.msra.mxu1 %v2421_v57  ;;  %v2427_v57 = vld [vmem:[#allocation7 + $0x38] sm:$0xff]  }
  0xbc   : > { %2276 = vmatprep.subr.bf16.mxu1 %v2422_v58 }
  0xbe   : > { %2205 = vmatmul.mubr.bf16.gmra.mrb[4].mxu1 %v430_v49 }
  0xbf   : > { %2208 = vmatprep.mubr.bf16.mxu1 %v431_v50 }
  0xc0   : > { %582 = vmatmul.mubr.bf16.gmra.mrb[8].mxu0 %v429_v40 }
  0xc1   : > { %591 = vmatprep.mubr.bf16.mxu0 %v2630_v0 }
  0xc6   : > { %2209 = vmatmul.mubr.bf16.gmra.mrb[8].mxu1 %v432_v55 }
  0xc8   : > { %592 = vmatmul.mubr.bf16.gmra.mrb[12].mxu0 %v430_v49 }
  0xc9   : > { %601 = vmatprep.mubr.bf16.mxu0 %v2630_v0 }
  0xd0   : > { %602 = vmatmul.mubr.bf16.gmra.mrb[16].mxu0 %v431_v50 }
  0xd1   : > { %611 = vmatprep.mubr.bf16.mxu0 %v2630_v0 }
  0xd8   : > { %612 = vmatmul.mubr.bf16.gmra.mrb[20].mxu0 %v432_v55  ;;  %v2426_v55 = vld [vmem:[#allocation7 + $0x28] sm:$0xff]  }
 0x183   : > { %v563_v60 = vpop.f32.mrb[0].mxu0 }
 0x184   : > { %v565_v61 = vpop.f32.mrb[1].mxu0 }
 0x185   : > { %623 = vst.msk [vmem:[%s2944_s20] sm:$0xff] %vm622_vm0, %v565_v61  ;;  %v567_v62 = vpop.f32.mrb[2].mxu0 }
 0x186   : > { %v2948_v63 = vpack.c.bf16 %v567_v62, %v563_v60  ;;  %v569_v0 = vpop.f32.mrb[3].mxu0 }
 0x187   : > { %624 = vst.msk [vmem:[%s2944_s20 + $0x8] sm:$0xff] %vm622_vm0, %v569_v0 }
 0x188   : > { %992 = vrot.lane.b32.xlu1 %v2948_v63, %s2631_s22  ;;  %2216 = vmatprep.mubr.msk.bf16.mxu1 %vm821_vm1, %v2948_v63 }
 0x189   : > { %v2202_v28 = vpop.f32.mrb[0].mxu1 }
 0x18a   : > { %v749_v30 = vadd.f32 %v2202_v28, %v1815_v29  ;;  %v740_v31 = vpop.f32.mrb[1].mxu1 }
 0x18b   : > { %v573_v1 = vpop.f32.mrb[4].mxu0  ;;  %v741_v32 = vadd.f32 %v1815_v29, %v740_v31  ;;  %v2203_v33 = vpop.f32.mrb[2].mxu1 }
 0x18c   : > { %v575_v2 = vpop.f32.mrb[5].mxu0  ;;  %789 = vst [vmem:[%s3002_s21 + $0x10] sm:$0xff] %v749_v30  ;;  %v752_v34 = vadd.f32 %v2203_v33, %v1815_v29  ;;  %v743_v35 = vpop.f32.mrb[3].mxu1 }
 0x18d   : > { %625 = vst.msk [vmem:[%s2944_s20 + $0x10] sm:$0xff] %vm622_vm0, %v575_v2  ;;  %v577_v3 = vpop.f32.mrb[6].mxu0  ;;  %787 = vst [vmem:[%s3002_s21] sm:$0xff] %v741_v32  ;;  %v744_v36 = vadd.f32 %v1815_v29, %v743_v35 }
 0x18e   : > { %v800_v4 = vpack.c.bf16 %v577_v3, %v573_v1  ;;  %v579_v5 = vpop.f32.mrb[7].mxu0  ;;  %790 = vst [vmem:[%s3002_s21 + $0x18] sm:$0xff] %v752_v34 }
 0x18f   : > { %626 = vst.msk [vmem:[%s2944_s20 + $0x18] sm:$0xff] %vm622_vm0, %v579_v5  ;;  %788 = vst [vmem:[%s3002_s21 + $0x8] sm:$0xff] %v744_v36 }
 0x190   : > { %2217 = vmatmul.mubr.msk.bf16.vlgmr.msra.gmra.mrb[12].mxu1 %vm821_vm1, %v800_v4 }
 0x191   : > { %2278 = vmatpush3.bf16.msra.mxu1 %v2422_v58  ;;  %v2206_v37 = vpop.f32.mrb[4].mxu1 }
 0x192   : > { %2277 = vmatprep.subr.bf16.mxu1 %v2423_v59  ;;  %v765_v38 = vadd.f32 %v2206_v37, %v1815_v29  ;;  %v756_v39 = vpop.f32.mrb[5].mxu1 }
 0x193   : > { %v583_v6 = vpop.f32.mrb[8].mxu0  ;;  %v757_v40 = vadd.f32 %v1815_v29, %v756_v39  ;;  %v2207_v41 = vpop.f32.mrb[6].mxu1 }
 0x194   : > { %v585_v7 = vpop.f32.mrb[9].mxu0  ;;  %793 = vst [vmem:[%s3002_s21 + $0x30] sm:$0xff] %v765_v38  ;;  %v768_v42 = vadd.f32 %v2207_v41, %v1815_v29  ;;  %v759_v43 = vpop.f32.mrb[7].mxu1 }
 0x195   : > { %627 = vst.msk [vmem:[%s2944_s20 + $0x20] sm:$0xff] %vm622_vm0, %v585_v7  ;;  %v587_v8 = vpop.f32.mrb[10].mxu0  ;;  %2279 = vmatpush3.bf16.msra.mxu1 %v2423_v59  ;;  %791 = vst [vmem:[%s3002_s21 + $0x20] sm:$0xff] %v757_v40  ;;  %v760_v44 = vadd.f32 %v1815_v29, %v759_v43 }
 0x196   : > { %v801_v9 = vpack.c.bf16 %v587_v8, %v583_v6  ;;  %v589_v10 = vpop.f32.mrb[11].mxu0  ;;  %2244 = vmatprep.subr.bf16.mxu1 %v2965_v11  ;;  %794 = vst [vmem:[%s3002_s21 + $0x38] sm:$0xff] %v768_v42 }
 0x197   : > { %628 = vst.msk [vmem:[%s2944_s20 + $0x28] sm:$0xff] %vm622_vm0, %v589_v10  ;;  %792 = vst [vmem:[%s3002_s21 + $0x28] sm:$0xff] %v760_v44 }
 0x198   : > { %996 = vrot.lane.b32.xlu0 %v801_v9, %s2631_s22  ;;  %2220 = vmatprep.mubr.msk.bf16.mxu1 %vm821_vm1, %v801_v9 }
 0x199   : > { %v2210_v45 = vpop.f32.mrb[8].mxu1 }
 0x19a   : > { %v781_v46 = vadd.f32 %v2210_v45, %v1815_v29  ;;  %v772_v47 = vpop.f32.mrb[9].mxu1 }
 0x19b   : > { %v593_v12 = vpop.f32.mrb[12].mxu0  ;;  %v773_v48 = vadd.f32 %v1815_v29, %v772_v47  ;;  %v2211_v49 = vpop.f32.mrb[10].mxu1 }
 0x19c   : > { %v595_v13 = vpop.f32.mrb[13].mxu0  ;;  %797 = vst [vmem:[%s3002_s21 + $0x50] sm:$0xff] %v781_v46  ;;  %v784_v50 = vadd.f32 %v2211_v49, %v1815_v29  ;;  %v775_v51 = vpop.f32.mrb[11].mxu1 }
 0x19d   : > { %629 = vst.msk [vmem:[%s2944_s20 + $0x30] sm:$0xff] %vm622_vm0, %v595_v13  ;;  %v597_v14 = vpop.f32.mrb[14].mxu0  ;;  %795 = vst [vmem:[%s3002_s21 + $0x40] sm:$0xff] %v773_v48  ;;  %v776_v52 = vadd.f32 %v1815_v29, %v775_v51 }
 0x19e   : > { %v802_v15 = vpack.c.bf16 %v597_v14, %v593_v12  ;;  %v599_v16 = vpop.f32.mrb[15].mxu0  ;;  %798 = vst [vmem:[%s3002_s21 + $0x58] sm:$0xff] %v784_v50 }
 0x19f   : > { %630 = vst.msk [vmem:[%s2944_s20 + $0x38] sm:$0xff] %vm622_vm0, %v599_v16  ;;  %796 = vst [vmem:[%s3002_s21 + $0x48] sm:$0xff] %v776_v52 }
 0x1a0   : > { %998 = vrot.lane.b32.xlu0 %v802_v15, %s2631_s22  ;;  %2221 = vmatmul.mubr.msk.bf16.gmra.mrb[16].mxu1 %vm821_vm1, %v802_v15 }
 0x1a3   : > { %v603_v18 = vpop.f32.mrb[16].mxu0 }
 0x1a4   : > { %994 = vrot.lane.b32.xlu0 %v800_v4, %s2631_s22  ;;  %v605_v19 = vpop.f32.mrb[17].mxu0 }
 0x1a5   : > { %631 = vst.msk [vmem:[%s2944_s20 + $0x40] sm:$0xff] %vm622_vm0, %v605_v19  ;;  %v607_v20 = vpop.f32.mrb[18].mxu0 }
 0x1a6   : > { %v803_v21 = vpack.c.bf16 %v607_v20, %v603_v18  ;;  %v609_v22 = vpop.f32.mrb[19].mxu0 }
 0x1a7   : > { %632 = vst.msk [vmem:[%s2944_s20 + $0x48] sm:$0xff] %vm622_vm0, %v609_v22 }
 0x1a8   : > { %1181 = vrot.lane.b32.xlu0 %v2948_v63, %s2632_s12  ;;  %1000 = vrot.lane.b32.xlu1 %v803_v21, %s2631_s22 }
 0x1a9   : > { %2224 = vmatprep.mubr.msk.bf16.mxu1 %vm821_vm1, %v803_v21 }
 0x1ab   : > { %v613_v23 = vpop.f32.mrb[20].mxu0 }
 0x1ac   : > { %1183 = vrot.lane.b32.xlu0 %v800_v4, %s2632_s12  ;;  %v615_v24 = vpop.f32.mrb[21].mxu0 }
 0x1ad   : > { %633 = vst.msk [vmem:[%s2944_s20 + $0x50] sm:$0xff] %vm622_vm0, %v615_v24  ;;  %v617_v25 = vpop.f32.mrb[22].mxu0 }
 0x1ae   : > { %v804_v26 = vpack.c.bf16 %v617_v25, %v613_v23  ;;  %v619_v27 = vpop.f32.mrb[23].mxu0 }
 0x1af   : > { %634 = vst.msk [vmem:[%s2944_s20 + $0x58] sm:$0xff] %vm622_vm0, %v619_v27  ;;  %s2542_s20 = scalar_lea.vmem %s3055_s13, 1536 }
 0x1b0   : > { %1185 = vrot.lane.b32.xlu0 %v801_v9, %s2632_s12  ;;  %1002 = vrot.lane.b32.xlu1 %v804_v26, %s2631_s22  ;;  %p2543_p3 = scmp.ne.s32.totalorder %s3055_s13, %s2542_s20  ;;  %s2634_s22 = smov [#allocation10]  }
 0x1b1   : > { %2225 = vmatmul.mubr.msk.bf16.gmra.mrb[20].mxu1 %vm821_vm1, %v804_v26 }
 0x1b2   : > { %p2544_p11 = pnand %p2543_p3, %p2834_p5 }
 0x1b4   : > { %1187 = vrot.lane.b32.xlu0 %v802_v15, %s2632_s12  ;;  %1370 = vrot.lane.b32.xlu1 %v2948_v63, %s2633_s10  ;;  %p2545_p12 = pneg %p2544_p11 }
 0x1b8   : > { %1189 = vrot.lane.b32.xlu0 %v803_v21, %s2632_s12  ;;  %1372 = vrot.lane.b32.xlu1 %v800_v4, %s2633_s10 }
 0x1bc   : > { %1191 = vrot.lane.b32.xlu0 %v804_v26, %s2632_s12  ;;  %1374 = vrot.lane.b32.xlu1 %v801_v9, %s2633_s10  ;;  %s2546_s12 = sshll.u32 %s2634_s22, 4  ;;  %s2547_s12 = int_to_ptr.vmem [resolvable:$false] %s2546_s12 }
 0x1bd   : > { %p2549_p1 = scmp.lt.s32.totalorder %s3055_s13, %s2547_s12 }
 0x1c0   : > { %1376 = vrot.lane.b32.xlu1 %v802_v15, %s2633_s10 }
 0x1c4   : > { %1378 = vrot.lane.b32.xlu1 %v803_v21, %s2633_s10 }
 0x1c8   : > { %1380 = vrot.lane.b32.xlu1 %v804_v26, %s2633_s10  ;;  %s2548_s10 = scalar_lea.vmem %s2547_s12, 3072 }
 0x1c9   : > { %p2550_p2 = scmp.lt.s32.totalorder %s2548_s10, %s2542_s20 }
 0x1cb   : > { %p2551_p4 = por %p2550_p2, %p2549_p1 }
 0x1cd   : > { %p2552_p9 = pnand %p2551_p4, %p2545_p12 }
 0x1fa   : > { %v993_v53 = vpop.permute.xlu1 %992 }
 0x1fb   : > { %2232 = vmatprep.mubr.msk.bf16.mxu0 %vm821_vm1, %v993_v53 }
 0x20a   : > { %v997_v54 = vpop.permute.xlu0 %996 }
 0x20b   : > { %2236 = vmatprep.mubr.msk.bf16.mxu1 %vm821_vm1, %v997_v54 }
 0x212   : > { %v999_v56 = vpop.permute.xlu0 %998 }
 0x213   : > { %2237 = vmatmul.mubr.msk.bf16.vlgmr.msra.gmra.mrb[24].mxu1 %vm821_vm1, %v999_v56 }
 0x214   : > { %2245 = vmatpush3.bf16.msra.mxu1 %v2965_v11 }
 0x215   : > { %2246 = vmatprep.subr.bf16.mxu1 %v2426_v55 }
 0x216   : > { %v995_v58 = vpop.permute.xlu0 %994 }
 0x217   : > { %2233 = vmatmul.mubr.msk.bf16.vlgmr.msra.gmra.mrb[24].mxu0 %vm821_vm1, %v995_v58 }
 0x218   : > { %2247 = vmatpush3.bf16.msra.mxu1 %v2426_v55  ;;  %2261 = vmatpush3.bf16.msra.mxu0 %v2972_v17 }
 0x219   : > { %2262 = vmatprep.subr.bf16.mxu0 %v2427_v57 }
 0x21a   : > { %v1001_v59 = vpop.permute.xlu1 %1000  ;;  %v1182_v60 = vpop.permute.xlu0 %1181 }
 0x21b   : > { %2240 = vmatprep.mubr.msk.bf16.mxu1 %vm821_vm1, %v1001_v59 }
 0x21c   : > { %2263 = vmatpush3.bf16.msra.mxu0 %v2427_v57 }
 0x21e   : > { %v1184_v61 = vpop.permute.xlu0 %1183 }
 0x222   : > { %v1003_v62 = vpop.permute.xlu1 %1002  ;;  %v1186_v0 = vpop.permute.xlu0 %1185 }
 0x223   : > { %2241 = vmatmul.mubr.msk.bf16.gmra.mrb[28].mxu1 %vm821_vm1, %v1003_v62 }
 0x224   : > { %2248 = vmatprep.mubr.msk.bf16.mxu1 %vm821_vm1, %v1182_v60 }
 0x226   : > { %v1371_v63 = vpop.permute.xlu1 %1370  ;;  %v1188_v2 = vpop.permute.xlu0 %1187 }
 0x227   : > { %2264 = vmatprep.mubr.msk.bf16.mxu0 %vm821_vm1, %v1371_v63 }
 0x22a   : > { %v1373_v1 = vpop.permute.xlu1 %1372  ;;  %v1190_v5 = vpop.permute.xlu0 %1189 }
 0x22b   : > { %2249 = vmatmul.mubr.msk.bf16.vlgmr.msra.gmra.mrb[32].mxu1 %vm821_vm1, %v1184_v61  ;;  %2265 = vmatmul.mubr.msk.bf16.vlgmr.msra.gmra.mrb[28].mxu0 %vm821_vm1, %v1373_v1 }
 0x22c   : > { %2252 = vmatprep.mubr.msk.bf16.mxu1 %vm821_vm1, %v1186_v0 }
 0x22e   : > { %v1375_v3 = vpop.permute.xlu1 %1374  ;;  %v1192_v7 = vpop.permute.xlu0 %1191 }
 0x22f   : > { %2268 = vmatprep.mubr.msk.bf16.mxu0 %vm821_vm1, %v1375_v3 }
 0x232   : > { %v1377_v4 = vpop.permute.xlu1 %1376 }
 0x233   : > { %2253 = vmatmul.mubr.msk.bf16.gmra.mrb[36].mxu1 %vm821_vm1, %v1188_v2  ;;  %2269 = vmatmul.mubr.msk.bf16.gmra.mrb[32].mxu0 %vm821_vm1, %v1377_v4 }
 0x234   : > { %2256 = vmatprep.mubr.msk.bf16.mxu1 %vm821_vm1, %v1190_v5 }
 0x236   : > { %v1379_v6 = vpop.permute.xlu1 %1378 }
 0x237   : > { %2272 = vmatprep.mubr.msk.bf16.mxu0 %vm821_vm1, %v1379_v6 }
 0x23a   : > { %v1381_v8 = vpop.permute.xlu1 %1380 }
 0x23b   : > { %2257 = vmatmul.mubr.msk.bf16.gmra.mrb[40].mxu1 %vm821_vm1, %v1192_v7  ;;  %2273 = vmatmul.mubr.msk.bf16.gmra.mrb[36].mxu0 %vm821_vm1, %v1381_v8 }
 0x263   : > { %v2218_v9 = vpop.f32.mrb[12].mxu1 }
 0x264   : > { %v874_v10 = vpop.f32.mrb[13].mxu1 }
 0x265   : > { %v2219_v11 = vpop.f32.mrb[14].mxu1 }
 0x266   : > { %v2003_v12 = vpack.c.bf16 %v2219_v11, %v2218_v9  ;;  %v877_v13 = vpop.f32.mrb[15].mxu1 }
 0x267   : > { %v1998_v14 = vpack.c.bf16 %v877_v13, %v874_v10 }
 0x268   : > { %2115 = vst [vmem:[%s3040_s26 + $0x8] sm:$0xff] %v2003_v12  }
 0x269   : > { %1999 = vst [vmem:[%s3040_s26] sm:$0xff] %v1998_v14  }
 0x273   : > { %v2222_v15 = vpop.f32.mrb[16].mxu1 }
 0x274   : > { %v890_v16 = vpop.f32.mrb[17].mxu1 }
 0x275   : > { %v2223_v17 = vpop.f32.mrb[18].mxu1 }
 0x276   : > { %v2013_v18 = vpack.c.bf16 %v2223_v17, %v2222_v15  ;;  %v893_v19 = vpop.f32.mrb[19].mxu1 }
 0x277   : > { %v2008_v20 = vpack.c.bf16 %v893_v19, %v890_v16 }
 0x278   : > { %2117 = vst [vmem:[%s3040_s26 + $0x18] sm:$0xff] %v2013_v18  }
 0x279   : > { %2116 = vst [vmem:[%s3040_s26 + $0x10] sm:$0xff] %v2008_v20  }
 0x284   : > { %v2226_v21 = vpop.f32.mrb[20].mxu1 }
 0x285   : > { %v906_v22 = vpop.f32.mrb[21].mxu1 }
 0x286   : > { %v2227_v23 = vpop.f32.mrb[22].mxu1 }
 0x287   : > { %v2023_v24 = vpack.c.bf16 %v2227_v23, %v2226_v21  ;;  %v909_v25 = vpop.f32.mrb[23].mxu1 }
 0x288   : > { %v2018_v26 = vpack.c.bf16 %v909_v25, %v906_v22 }
 0x289   : > { %2119 = vst [vmem:[%s3040_s26 + $0x28] sm:$0xff] %v2023_v24  }
 0x28a   : > { %2118 = vst [vmem:[%s3040_s26 + $0x20] sm:$0xff] %v2018_v26  }
 0x28b   : > { %2555 = shalt.err (!%p2552_p9)
}
 0x28c   : > { %s2556_s14 = scalar_lea.hbm %s3053_s18, 1536  ;;  %s2560_s27 = scalar_lea.hbm %s3143_s6, 3072 }
 0x28d   : > { %p2557_p0 = scmp.ne.s32.totalorder %s3053_s18, %s2556_s14  ;;  %p2561_p13 = scmp.lt.u32.totalorder %s3053_s18, %s3143_s6 }
 0x28e   : > { %p2562_p6 = scmp.lt.u32.totalorder %s2560_s27, %s2556_s14  ;;  %p2564_p3 = scmp.lt.u32.totalorder %s2556_s14, %s3053_s18 }
 0x28f   : > { %p2558_p7 = pnand %p2557_p0, %p2834_p5 }
 0x290   : > { %p2563_p10 = por %p2562_p6, %p2561_p13 }
 0x291   : > { %p2559_p8 = pneg %p2558_p7 }
 0x292   : > { %p2565_p11 = por %p2564_p3, %p2563_p10 }
 0x294   : > { %p2566_p12 = pnand %p2565_p11, %p2559_p8 }
 0x296   : > { %2569 = shalt.err (!%p2566_p12)
}
 0x297   : > { %s2635_s15 = smov 128   ;;  %s2636_s20 = smov 8  }
 0x298   : > { %2297 = dma.vmem_to_hbm [thread:$0]  (%p2834_p5), %s3055_s13, 1536, %s3053_s18, %s1555_s19, %s2635_s15, %s2635_s15, %s2636_s20  }
 0x299   : > { %s1560_s13 = scalar_lea.sflag [#allocation12], %s2885_s2 }
 0x2e6   : > { %v2238_v27 = vpop.f32.mrb[24].mxu1 }
 0x2e7   : > { %v1084_v28 = vpop.f32.mrb[25].mxu1 }
 0x2e8   : > { %v2239_v29 = vpop.f32.mrb[26].mxu1 }
 0x2e9   : > { %v2043_v30 = vpack.c.bf16 %v2239_v29, %v2238_v27  ;;  %v1087_v31 = vpop.f32.mrb[27].mxu1 }
 0x2ea   : > { %v2038_v32 = vpack.c.bf16 %v1087_v31, %v1084_v28  ;;  %v2234_v33 = vpop.f32.mrb[24].mxu0 }
 0x2eb   : > { %2123 = vst [vmem:[%s3040_s26 + $0x48] sm:$0xff] %v2043_v30   ;;  %v1068_v34 = vpop.f32.mrb[25].mxu0 }
 0x2ec   : > { %2122 = vst [vmem:[%s3040_s26 + $0x40] sm:$0xff] %v2038_v32   ;;  %v2235_v35 = vpop.f32.mrb[26].mxu0 }
 0x2ed   : > { %v2033_v36 = vpack.c.bf16 %v2235_v35, %v2234_v33  ;;  %v1071_v37 = vpop.f32.mrb[27].mxu0 }
 0x2ee   : > { %v2028_v38 = vpack.c.bf16 %v1071_v37, %v1068_v34 }
 0x2ef   : > { %2121 = vst [vmem:[%s3040_s26 + $0x38] sm:$0xff] %v2033_v36  }
 0x2f0   : > { %2120 = vst [vmem:[%s3040_s26 + $0x30] sm:$0xff] %v2028_v38  }
 0x2f6   : > { %v2242_v39 = vpop.f32.mrb[28].mxu1 }
 0x2f7   : > { %v1100_v40 = vpop.f32.mrb[29].mxu1 }
 0x2f8   : > { %v2243_v41 = vpop.f32.mrb[30].mxu1 }
 0x2f9   : > { %v2053_v42 = vpack.c.bf16 %v2243_v41, %v2242_v39  ;;  %v1103_v43 = vpop.f32.mrb[31].mxu1 }
 0x2fa   : > { %v2048_v44 = vpack.c.bf16 %v1103_v43, %v1100_v40 }
 0x2fb   : > { %2125 = vst [vmem:[%s3040_s26 + $0x58] sm:$0xff] %v2053_v42  }
 0x2fc   : > { %2124 = vst [vmem:[%s3040_s26 + $0x50] sm:$0xff] %v2048_v44  }
 0x2fe   : > { %v2250_v45 = vpop.f32.mrb[32].mxu1  ;;  %v2266_v46 = vpop.f32.mrb[28].mxu0 }
 0x2ff   : > { %v1257_v47 = vpop.f32.mrb[33].mxu1  ;;  %v1446_v48 = vpop.f32.mrb[29].mxu0 }
 0x300   : > { %v2251_v49 = vpop.f32.mrb[34].mxu1  ;;  %v2267_v50 = vpop.f32.mrb[30].mxu0 }
 0x301   : > { %v2063_v51 = vpack.c.bf16 %v2251_v49, %v2250_v45  ;;  %v2093_v52 = vpack.c.bf16 %v2267_v50, %v2266_v46  ;;  %v1260_v53 = vpop.f32.mrb[35].mxu1  ;;  %v1449_v54 = vpop.f32.mrb[31].mxu0 }
 0x302   : > { %v2058_v55 = vpack.c.bf16 %v1260_v53, %v1257_v47  ;;  %v2088_v56 = vpack.c.bf16 %v1449_v54, %v1446_v48 }
 0x303   : > { %2127 = vst [vmem:[%s3040_s26 + $0x68] sm:$0xff] %v2063_v51   ;;  %2133 = vst [vmem:[%s3040_s26 + $0x98] sm:$0xff] %v2093_v52  }
 0x304   : > { %2126 = vst [vmem:[%s3040_s26 + $0x60] sm:$0xff] %v2058_v55   ;;  %2132 = vst [vmem:[%s3040_s26 + $0x90] sm:$0xff] %v2088_v56  }
 0x306   : > { %v2254_v57 = vpop.f32.mrb[36].mxu1  ;;  %v2270_v58 = vpop.f32.mrb[32].mxu0 }
 0x307   : > { %v1273_v59 = vpop.f32.mrb[37].mxu1  ;;  %v1462_v60 = vpop.f32.mrb[33].mxu0 }
 0x308   : > { %v2255_v61 = vpop.f32.mrb[38].mxu1  ;;  %v2271_v62 = vpop.f32.mrb[34].mxu0 }
 0x309   : > { %v2073_v63 = vpack.c.bf16 %v2255_v61, %v2254_v57  ;;  %v2103_v0 = vpack.c.bf16 %v2271_v62, %v2270_v58  ;;  %v1276_v1 = vpop.f32.mrb[39].mxu1  ;;  %v1465_v2 = vpop.f32.mrb[35].mxu0 }
 0x30a   : > { %v2068_v3 = vpack.c.bf16 %v1276_v1, %v1273_v59  ;;  %v2098_v4 = vpack.c.bf16 %v1465_v2, %v1462_v60 }
 0x30b   : > { %2129 = vst [vmem:[%s3040_s26 + $0x78] sm:$0xff] %v2073_v63   ;;  %2135 = vst [vmem:[%s3040_s26 + $0xa8] sm:$0xff] %v2103_v0  }
 0x30c   : > { %2128 = vst [vmem:[%s3040_s26 + $0x70] sm:$0xff] %v2068_v3   ;;  %2134 = vst [vmem:[%s3040_s26 + $0xa0] sm:$0xff] %v2098_v4  }
 0x30e   : > { %v2258_v5 = vpop.f32.mrb[40].mxu1  ;;  %v2274_v6 = vpop.f32.mrb[36].mxu0 }
 0x30f   : > { %v1289_v7 = vpop.f32.mrb[41].mxu1  ;;  %v1478_v8 = vpop.f32.mrb[37].mxu0 }
 0x310   : > { %v2259_v9 = vpop.f32.mrb[42].mxu1  ;;  %v2275_v10 = vpop.f32.mrb[38].mxu0 }
 0x311   : > { %v2083_v11 = vpack.c.bf16 %v2259_v9, %v2258_v5  ;;  %v2113_v12 = vpack.c.bf16 %v2275_v10, %v2274_v6  ;;  %v1292_v13 = vpop.f32.mrb[43].mxu1  ;;  %v1481_v14 = vpop.f32.mrb[39].mxu0 }
 0x312   : > { %v2078_v15 = vpack.c.bf16 %v1292_v13, %v1289_v7  ;;  %v2108_v16 = vpack.c.bf16 %v1481_v14, %v1478_v8 }
 0x313   : > { %2131 = vst [vmem:[%s3040_s26 + $0x88] sm:$0xff] %v2083_v11   ;;  %2137 = vst [vmem:[%s3040_s26 + $0xb8] sm:$0xff] %v2113_v12  }
 0x314   : > { %2130 = vst [vmem:[%s3040_s26 + $0x80] sm:$0xff] %v2078_v15   ;;  %2136 = vst [vmem:[%s3040_s26 + $0xb0] sm:$0xff] %v2108_v16  }
 0x315   : > { %s1994_s18 = smul.u32 768, %s2710_s9  ;;  %s1610_s19 = sshll.u32 %s3040_s26, 4  ;;  %s1611_s19 = int_to_ptr.vmem [resolvable:$true] %s1610_s19 }
 0x316   : > { %s2637_s14 = smov 768   ;;  %s2638_s2 = smov 1536  }
 0x317   : > { %s1593_s10 = scalar_lea.hbm %s3144_s7, %s1994_s18  ;;  %2298 = sst [smem:[#allocation14]] (%p2834_p5), %s2637_s14 }
 0x318   : > { %2299 = sst [smem:[#allocation14 + $0x1]] (%p2834_p5), %s2638_s2  ;;  %s2639_s17 = smov 12  }
 0x319   : > { %2300 = sst [smem:[#allocation14 + $0x2]] (%p2834_p5), %s2639_s17  ;;  %s2640_s21 = smov 64  }
 0x31a   : > { %2301 = sst [smem:[#allocation14 + $0x3]] (%p2834_p5), %s2640_s21  ;;  %s2641_s9 = smov 4  }
 0x31b   : > { %2302 = sst [smem:[#allocation14 + $0x4]] (%p2834_p5), %s2640_s21  ;;  %s2642_s26 = smov [#allocation13]  }
 0x31c   : > { %2303 = sst [smem:[#allocation14 + $0x5]] (%p2834_p5), %s2641_s9  ;;  %s2643_s27 = smov 0  }
 0x31d   : > { %2304 = dma.general (%p2834_p5), %s1611_s19, 3072, %s1593_s10, %s1560_s13, %s2642_s26, [#allocation14], %s2643_s27, 0  }
 0x31e PF: > { %s3173_s11 = sld [smem:[#allocation20_spill]]  ;;  %s3174_s23 = sld [smem:[#allocation21_spill]] }
 0x31f   : > { %p3176_p2 = scmp.ge.s32.totalorder %s2620_s30, 2 }
 0x324   : > { %s1642_s15 = sand.u32 1, %s3173_s11   ;;  %p3175_p1 = scmp.ne.s32.totalorder %s3174_s23, 0 }
 0x325   : > { %s1643_s20 = scalar_lea.sflag [#allocation4], %s1642_s15 }
 0x326   : > { %p2322_p4 = pnand %p3176_p2, %p3175_p1 }
 0x328   : > { %2599 = dma.done.wait (!%p2322_p4), %s1643_s20, 1536  }
 0x329   : > { %2601 = vsyncadd (!%p2322_p4), %s1643_s20, 4294965760  ;;  %s1652_s18 = scalar_lea.sflag [#allocation12], %s1642_s15 }
 0x32a   : > { %2603 = dma.done.wait (!%p2322_p4), %s1652_s18, 3072  }
 0x32b   : > { %2605 = vsyncadd (!%p2322_p4), %s1652_s18, 4294964224  ;;  %p27_p5 = scmp.ge.s32.totalorder %s2802_s25, 4   ;;  %s3177_s27 = smov %s2612_s28 }
 0x32c   : > { %s3178_s28 = smov %s2616_s29  ;;  %s3179_s29 = smov %s2830_s16 }
 0x32d   : > { %s3180_s30 = smov %s2802_s25  ;;  %29 = sbr.rel (!%p27_p5) target bundleno = 11 (0xb), region = 141 }
 0x334   :  { %1665 = vsyncpa [#allocation3], 1 }
 0x335   :  { %1667 = vsyncpa [#allocation3 + $0x1], 1 }
 0x336   :  { %1668 = vsyncpa [#allocation6], 1 }
 0x337   :  { %1669 = vsyncpa [#allocation9], 1 }
 0x338   :  { %1670 = vsyncpa [#allocation4], 1 }
 0x339   :  { %1672 = vsyncpa [#allocation4 + $0x1], 1 }
 0x33a   :  { %1673 = vsyncpa [#allocation12], 1 }
 0x33b   :  { %1675 = vsyncpa [#allocation12 + $0x1], 1 }

</bundles_post_ra>
